<compile_context>
chip_gen: v7x
topology: tpu7x:2x2x1
jax: 0.10.0
libtpu: 0.0.40
codegen_flags: <defaults>
</compile_context>

<pallas_src>
import functools

import jax
import jax.numpy as jnp
from jax.experimental import pallas as pl
from jax.experimental.pallas import tpu as pltpu


def _accuracy_kernel(x_ref, t_ref, inter_ref, tcnt_ref, *, hw):
    # x_ref:     (1, C, TILE_P) logits (native dtype)
    # t_ref:     (1, 1, TILE_P) int32 labels
    # inter_ref: (1, C, 1) float32 per-class intersection counts (accumulated)
    # tcnt_ref:  (1, C, 1) float32 per-class target counts (accumulated)
    c = x_ref.shape[1]
    tile_p = x_ref.shape[2]

    x = x_ref[0].astype(jnp.float32)   # (C, TILE_P); cast in-regs (v5e has no bf16 VALU)
    t = t_ref[0]                       # (1, TILE_P) int32

    cls_iota = jax.lax.broadcasted_iota(jnp.int32, (c, tile_p), 0)

    # Argmax over the class (sublane) axis, first-occurrence tie-break
    # (matches torch.max), using dense reductions instead of a per-class loop.
    max_val = jnp.max(x, axis=0, keepdims=True)                       # (1, TILE_P)
    pred = jnp.min(jnp.where(x >= max_val, cls_iota, jnp.int32(c)),
                   axis=0, keepdims=True)                             # (1, TILE_P)

    # One-hot of the target over the class axis; mask padded lanes of the last
    # (partial) pixel tile so they never contribute to the counts.
    onehot_t = cls_iota == t                                          # (C, TILE_P)
    if hw % tile_p != 0:
        base = pl.program_id(1) * tile_p
        lane = jax.lax.broadcasted_iota(jnp.int32, (1, tile_p), 1)
        onehot_t = onehot_t & ((base + lane) < hw)

    match = pred == t                                                 # (1, TILE_P)
    inter_tile = jnp.sum((onehot_t & match).astype(jnp.float32),
                         axis=1, keepdims=True)                       # (C, 1)
    tcnt_tile = jnp.sum(onehot_t.astype(jnp.float32),
                        axis=1, keepdims=True)                        # (C, 1)

    # Accumulate into the resident output block (same block index across the
    # pixel-tile axis); zero it on the first tile of every image.
    @pl.when(pl.program_id(1) == 0)
    def _():
        inter_ref[...] = jnp.zeros_like(inter_ref)
        tcnt_ref[...] = jnp.zeros_like(tcnt_ref)

    inter_ref[0] += inter_tile
    tcnt_ref[0] += tcnt_tile


def accuracy(logits_nchw, target_nhw):
    """Pallas TPU implementation of Accuracy.forward.

    logits_nchw: (N, C, H, W) float logits
    target_nhw:  (NT, HT, WT) integer class labels
    returns: scalar float32 (percentage)
    """
    n, c, h, w = logits_nchw.shape
    nt, ht, wt = target_nhw.shape

    # Center crop of target (matches Accuracy.crop exactly).
    offset_w, offset_h = (wt - w) // 2, (ht - h) // 2
    if offset_w > 0 and offset_h > 0:
        target_nhw = target_nhw[:, offset_h:ht - offset_h, offset_w:wt - offset_w]

    hw = h * w
    # Free reshapes only -- no transpose, no dtype upcast in HBM.
    x = logits_nchw.reshape(n, c, hw)
    t = target_nhw.reshape(n, 1, hw).astype(jnp.int32)

    # Pixel-tile size: big lane-dense tiles, capped so a double-buffered logits
    # tile stays well under v7x's 64 MiB VMEM (<= ~8 MiB per buffer).
    itemsize = jnp.dtype(x.dtype).itemsize
    max_tile = max(128, ((8 * 1024 * 1024) // max(1, c * itemsize)) // 128 * 128)
    if hw <= max_tile:
        tile_p = hw                      # full-extent block (always legal)
    else:
        tile_p = min(max_tile, 16384)    # multiple of 128
    num_tiles = pl.cdiv(hw, tile_p)

    inter_parts, tcnt_parts = pl.pallas_call(
        functools.partial(_accuracy_kernel, hw=hw),
        out_shape=(
            jax.ShapeDtypeStruct((n, c, 1), jnp.float32),
            jax.ShapeDtypeStruct((n, c, 1), jnp.float32),
        ),
        grid=(n, num_tiles),
        in_specs=[
            pl.BlockSpec((1, c, tile_p), lambda i, p: (i, 0, p)),
            pl.BlockSpec((1, 1, tile_p), lambda i, p: (i, 0, p)),
        ],
        out_specs=[
            pl.BlockSpec((1, c, 1), lambda i, p: (i, 0, 0)),
            pl.BlockSpec((1, c, 1), lambda i, p: (i, 0, 0)),
        ],
        compiler_params=pltpu.CompilerParams(
            dimension_semantics=("parallel", "arbitrary")),
    )(x, t)

    # Tiny JAX epilogue: global accumulation over N, then the non-linear
    # smoothing + averaging (must happen after global accumulation).
    inter = jnp.sum(inter_parts[:, :, 0], axis=0)   # (C,)
    tcnt = jnp.sum(tcnt_parts[:, :, 0], axis=0)     # (C,)
    res = jnp.sum((inter + 1.0) / (tcnt + 1.0)) / jnp.float32(c) * jnp.float32(100.0)
    return res


if __name__ == "__main__":
    key = jax.random.PRNGKey(0)
    k1, k2 = jax.random.split(key)

    N, C, H, W = 2, 4, 16, 16
    logits = jax.random.normal(k1, (N, C, H, W), dtype=jnp.float32)
    target = jax.random.randint(k2, (N, H, W), 0, C, dtype=jnp.int32)

    res = accuracy(logits, target)
    jax.block_until_ready(res)

    # pure-JAX reference (mirrors the PyTorch module)
    prob = jax.nn.softmax(logits, axis=1)
    maxprob = jnp.argmax(prob, axis=1)
    ref = 0.0
    for cl in range(C):
        inter = jnp.sum(((maxprob == cl) & (target == cl)).astype(jnp.float32))
        tcnt = jnp.sum((target == cl).astype(jnp.float32))
        ref = ref + (inter + 1.0) / (tcnt + 1.0)
    ref = ref / C * 100.0

    assert jnp.allclose(res, ref, rtol=1e-5, atol=1e-5), (res, ref)
    print("KERNEL_OK")
</pallas_src>

<mosaic_0001>
module attributes {stable_mosaic.version = 11 : i64} {
  func.func @_accuracy_kernel(%arg0: i32, %arg1: i32, %arg2: memref<1x4x256xf32, #tpu.memory_space<vmem>>, %arg3: memref<1x1x256xi32, #tpu.memory_space<vmem>>, %arg4: memref<1x4x1xf32, #tpu.memory_space<vmem>>, %arg5: memref<1x4x1xf32, #tpu.memory_space<vmem>>) attributes {dimension_semantics = [#tpu.dimension_semantics<parallel>, #tpu.dimension_semantics<arbitrary>], iteration_bounds = array<i64: 2, 1>, scalar_prefetch = 0 : i64, scratch_operands = 0 : i64, tpu.core_type = #tpu.core_type<tc>, window_params = [{transform_indices = @transform_0, window_bounds = array<i64: 1, 4, 256>}, {transform_indices = @transform_1, window_bounds = array<i64: 1, 1, 256>}, {transform_indices = @transform_2, window_bounds = array<i64: 1, 4, 1>}, {transform_indices = @transform_3, window_bounds = array<i64: 1, 4, 1>}]} {
    %c0 = arith.constant 0 : index
    %c0_0 = arith.constant 0 : index
    %c0_1 = arith.constant 0 : index
    %0 = vector.load %arg2[%c0, %c0_0, %c0_1] : memref<1x4x256xf32, #tpu.memory_space<vmem>>, vector<1x4x256xf32>
    %1 = vector.shape_cast %0 : vector<1x4x256xf32> to vector<4x256xf32>
    %c0_2 = arith.constant 0 : index
    %c0_3 = arith.constant 0 : index
    %c0_4 = arith.constant 0 : index
    %2 = vector.load %arg3[%c0_2, %c0_3, %c0_4] : memref<1x1x256xi32, #tpu.memory_space<vmem>>, vector<1x1x256xi32>
    %3 = vector.shape_cast %2 : vector<1x1x256xi32> to vector<1x256xi32>
    %4 = tpu.iota {dimensions = array<i32: 0>} : vector<4x256xi32>
    %cst = arith.constant dense<0xFF800000> : vector<256xf32>
    %5 = vector.multi_reduction <maximumf>, %1, %cst [0] : vector<4x256xf32> to vector<256xf32>
    %6 = vector.shape_cast %5 : vector<256xf32> to vector<1x256xf32>
    %7 = vector.broadcast %6 : vector<1x256xf32> to vector<4x256xf32>
    %8 = arith.cmpf oge, %1, %7 : vector<4x256xf32>
    %c4_i32 = arith.constant 4 : i32
    %9 = vector.broadcast %c4_i32 : i32 to vector<4x256xi32>
    %10 = arith.select %8, %4, %9 : vector<4x256xi1>, vector<4x256xi32>
    %cst_5 = arith.constant dense<2147483647> : vector<256xi32>
    %11 = vector.multi_reduction <minsi>, %10, %cst_5 [0] : vector<4x256xi32> to vector<256xi32>
    %12 = vector.shape_cast %11 : vector<256xi32> to vector<1x256xi32>
    %13 = vector.broadcast %3 : vector<1x256xi32> to vector<4x256xi32>
    %14 = arith.cmpi eq, %4, %13 : vector<4x256xi32>
    %15 = arith.cmpi eq, %12, %3 : vector<1x256xi32>
    %16 = vector.broadcast %15 : vector<1x256xi1> to vector<4x256xi1>
    %17 = arith.andi %14, %16 : vector<4x256xi1>
    %18 = arith.extui %17 : vector<4x256xi1> to vector<4x256xi32>
    %19 = arith.sitofp %18 : vector<4x256xi32> to vector<4x256xf32>
    %cst_6 = arith.constant dense<0.000000e+00> : vector<4xf32>
    %20 = vector.multi_reduction <add>, %19, %cst_6 [1] : vector<4x256xf32> to vector<4xf32>
    %21 = vector.shape_cast %20 : vector<4xf32> to vector<4x1xf32>
    %22 = arith.extui %14 : vector<4x256xi1> to vector<4x256xi32>
    %23 = arith.sitofp %22 : vector<4x256xi32> to vector<4x256xf32>
    %cst_7 = arith.constant dense<0.000000e+00> : vector<4xf32>
    %24 = vector.multi_reduction <add>, %23, %cst_7 [1] : vector<4x256xf32> to vector<4xf32>
    %25 = vector.shape_cast %24 : vector<4xf32> to vector<4x1xf32>
    %c0_i32 = arith.constant 0 : i32
    %26 = arith.cmpi eq, %arg1, %c0_i32 : i32
    %27 = arith.extui %26 : i1 to i32
    %c0_i32_8 = arith.constant 0 : i32
    %28 = arith.cmpi ne, %27, %c0_i32_8 : i32
    scf.if %28 {
      %cst_21 = arith.constant 0.000000e+00 : f32
      %41 = vector.broadcast %cst_21 : f32 to vector<1x4x1xf32>
      %c0_22 = arith.constant 0 : index
      %c0_23 = arith.constant 0 : index
      %c0_24 = arith.constant 0 : index
      %42 = vector.load %arg4[%c0_22, %c0_23, %c0_24] : memref<1x4x1xf32, #tpu.memory_space<vmem>>, vector<1x4x1xf32>
      tpu.vector_store %arg4[%c0_22, %c0_23, %c0_24], %41 {strides = array<i32>} : memref<1x4x1xf32, #tpu.memory_space<vmem>>, vector<1x4x1xf32>,
      %cst_25 = arith.constant 0.000000e+00 : f32
      %43 = vector.broadcast %cst_25 : f32 to vector<1x4x1xf32>
      %c0_26 = arith.constant 0 : index
      %c0_27 = arith.constant 0 : index
      %c0_28 = arith.constant 0 : index
      %44 = vector.load %arg5[%c0_26, %c0_27, %c0_28] : memref<1x4x1xf32, #tpu.memory_space<vmem>>, vector<1x4x1xf32>
      tpu.vector_store %arg5[%c0_26, %c0_27, %c0_28], %43 {strides = array<i32>} : memref<1x4x1xf32, #tpu.memory_space<vmem>>, vector<1x4x1xf32>,
    } else {
    }
    %c0_9 = arith.constant 0 : index
    %c0_10 = arith.constant 0 : index
    %c0_11 = arith.constant 0 : index
    %29 = vector.load %arg4[%c0_9, %c0_10, %c0_11] : memref<1x4x1xf32, #tpu.memory_space<vmem>>, vector<1x4x1xf32>
    %30 = vector.shape_cast %29 : vector<1x4x1xf32> to vector<4x1xf32>
    %31 = arith.addf %30, %21 : vector<4x1xf32>
    %c0_12 = arith.constant 0 : index
    %c0_13 = arith.constant 0 : index
    %c0_14 = arith.constant 0 : index
    %32 = vector.load %arg4[%c0_12, %c0_13, %c0_14] : memref<1x4x1xf32, #tpu.memory_space<vmem>>, vector<1x4x1xf32>
    %33 = vector.shape_cast %32 : vector<1x4x1xf32> to vector<4x1xf32>
    %34 = vector.shape_cast %31 : vector<4x1xf32> to vector<1x4x1xf32>
    tpu.vector_store %arg4[%c0_12, %c0_13, %c0_14], %34 {strides = array<i32>} : memref<1x4x1xf32, #tpu.memory_space<vmem>>, vector<1x4x1xf32>,
    %c0_15 = arith.constant 0 : index
    %c0_16 = arith.constant 0 : index
    %c0_17 = arith.constant 0 : index
    %35 = vector.load %arg5[%c0_15, %c0_16, %c0_17] : memref<1x4x1xf32, #tpu.memory_space<vmem>>, vector<1x4x1xf32>
    %36 = vector.shape_cast %35 : vector<1x4x1xf32> to vector<4x1xf32>
    %37 = arith.addf %36, %25 : vector<4x1xf32>
    %c0_18 = arith.constant 0 : index
    %c0_19 = arith.constant 0 : index
    %c0_20 = arith.constant 0 : index
    %38 = vector.load %arg5[%c0_18, %c0_19, %c0_20] : memref<1x4x1xf32, #tpu.memory_space<vmem>>, vector<1x4x1xf32>
    %39 = vector.shape_cast %38 : vector<1x4x1xf32> to vector<4x1xf32>
    %40 = vector.shape_cast %37 : vector<4x1xf32> to vector<1x4x1xf32>
    tpu.vector_store %arg5[%c0_18, %c0_19, %c0_20], %40 {strides = array<i32>} : memref<1x4x1xf32, #tpu.memory_space<vmem>>, vector<1x4x1xf32>,
    return
  }
  func.func @transform_0(%arg0: i32, %arg1: i32) -> (i32, i32, i32) {
    %c0_i32 = arith.constant 0 : i32
    %c0_i32_0 = arith.constant 0 : i32
    return %arg0, %c0_i32, %arg1 : i32, i32, i32
  }
  func.func @transform_1(%arg0: i32, %arg1: i32) -> (i32, i32, i32) {
    %c0_i32 = arith.constant 0 : i32
    %c0_i32_0 = arith.constant 0 : i32
    return %arg0, %c0_i32, %arg1 : i32, i32, i32
  }
  func.func @transform_2(%arg0: i32, %arg1: i32) -> (i32, i32, i32) {
    %c0_i32 = arith.constant 0 : i32
    %c0_i32_0 = arith.constant 0 : i32
    %c0_i32_1 = arith.constant 0 : i32
    return %arg0, %c0_i32, %c0_i32_0 : i32, i32, i32
  }
  func.func @transform_3(%arg0: i32, %arg1: i32) -> (i32, i32, i32) {
    %c0_i32 = arith.constant 0 : i32
    %c0_i32_0 = arith.constant 0 : i32
    %c0_i32_1 = arith.constant 0 : i32
    return %arg0, %c0_i32, %c0_i32_0 : i32, i32, i32
  }
}

</mosaic_0001>

<bundles_post_ra>
// kernel: tpu_custom_call.1
= control target key start
LH: loop header
LB: loop body
LE: loop exit
PB: predicated region body
PF: predicated region fallthrough
CT: control target
= control target key end

     0   :  { %9 = vsyncpa [#allocation3], 0  ;;  %s935_s0 = inlined_call_operand.hbm [shape: f32[2,4,256], index: 0, kind: input, shape index: {}]   ;;  %s936_s1 = inlined_call_operand.hbm [shape: s32[2,1,256], index: 1, kind: input, shape index: {}]   ;;  %s937_s2 = inlined_call_operand.vmem [shape: f32[2,4,1], index: 2, kind: output, shape index: {0}]   ;;  %s938_s3 = inlined_call_operand.vmem [shape: f32[2,4,1], index: 3, kind: output, shape index: {1}]  }
   0x1   :  { %11 = vsyncpa [#allocation3 + $0x1], 0 }
   0x2   :  { %12 = vsyncpa [#allocation5], 0 }
   0x3   :  { %14 = vsyncpa [#allocation5 + $0x1], 0  ;;  %s733_s12 = smov 0   ;;  %s735_s13 = smov 0  }
   0x4   :  { %s737_s14 = smov 0   ;;  %s739_s15 = smov 0  }
   0x5   :  { %s741_s16 = smov 0   ;;  %s743_s17 = smov 0  }
   0x6 LB: > { %s505_s18 = sadd.s32 4294967295, %s706_s17   ;;  %s32_s19 = sadd.s32 1, %s702_s16  ;;  %s706_s17 = sphi %s743_s17, %s20_s17   ;;  %s702_s16 = sphi %s741_s16, %s952_s16   ;;  %s698_s15 = sphi %s739_s15, %s951_s15   ;;  %s694_s14 = sphi %s737_s14, %s950_s14   ;;  %s690_s13 = sphi %s735_s13, %s949_s13   ;;  %s686_s12 = sphi %s733_s12, %s948_s12  }
   0x7   : > { %p34_p0 = scmp.ge.s32.totalorder %s32_s19, 2  ;;  %s41_s20 = sadd.s32 1, %s694_s14 }
   0x8   : > { %p48_p1 = scmp.ne.s32.totalorder %s694_s14, %s690_s13  ;;  %p49_p2 = scmp.eq.s32.totalorder %s706_s17, 0 }
   0x9   : > { %s954_s19 = smov (%p34_p0, %s32_s19), 0  ;;  %p54_p4 = scmp.ne.s32.totalorder %s690_s13, %s686_s12 }
   0xa   : > { %p769_p3 = por %p49_p2, %p48_p1  ;;  %s36_s22 = ssub.s32 %s702_s16, %s954_s19 }
   0xb   : > { %p55_p5 = scmp.eq.s32.totalorder %s505_s18, 0  ;;  %p39_p6 = scmp.eq.s32.totalorder %s36_s22, 0 }
   0xc   : > { %p539_p8 = scmp.lt.s32.totalorder %s706_s17, 2  ;;  %s785_s25 = sand.u32 1, %s694_s14  }
   0xd   : > { %p776_p7 = por %p55_p5, %p54_p4  ;;  %s526_s26 = sshll.u32 %s702_s16, 7 }
   0xe   : > { %s782_s24 = scalar_select %p39_p6, %s694_s14, %s41_s20  }
   0xf   : > { %s941_s23 = scalar_select %p776_p7, 1, 0 }
  0x10   : > { %s509_s27 = sshll.u32 %s785_s25, 3  ;;  %s792_s30 = scalar_lea.hbm %s935_s0, %s526_s26 }
  0x11   : > { %s162_s4 = scalar_lea.vmem [#allocation2], %s509_s27  ;;  %p796_p9 = pnand %p539_p8, %p769_p3 }
  0x12   : > { %s172_s5 = sshll.u32 %s162_s4, 4  ;;  %s159_s7 = scalar_lea.sflag [#allocation3], %s785_s25  ;;  %s800_s5 = int_to_ptr.vmem [resolvable:$true] %s172_s5 }
  0x13   : > { %s592_s8 = scalar_lea.hbm %s792_s30, 128  ;;  %p594_p13 = pneg %p796_p9 }
  0x14   : > { %p593_p12 = scmp.ne.s32.totalorder %s792_s30, %s592_s8  ;;  %s597_s11 = scalar_lea.hbm %s935_s0, 256 }
  0x15   : > { %p598_p2 = scmp.lt.u32.totalorder %s792_s30, %s935_s0  ;;  %p599_p3 = scmp.lt.u32.totalorder %s597_s11, %s592_s8 }
  0x16   : > { %p595_p0 = pnand %p594_p13, %p593_p12  ;;  %p601_p5 = scmp.lt.u32.totalorder %s592_s8, %s792_s30 }
  0x17   : > { %p600_p4 = por %p599_p3, %p598_p2 }
  0x18   : > { %p596_p1 = pneg %p595_p0 }
  0x19   : > { %p602_p6 = por %p601_p5, %p600_p4 }
  0x1b   : > { %p603_p8 = pnand %p602_p6, %p596_p1 }
  0x1d   : > { %606 = shalt.err (!%p603_p8)
}
  0x1e   : > { %s607_s20 = scalar_lea.vmem %s800_s5, 128  ;;  %s708_s21 = smov [#allocation2]  }
  0x1f   : > { %p608_p12 = scmp.ne.s32.totalorder %s800_s5, %s607_s20  ;;  %s612_s22 = sshll.u32 %s708_s21, 4  ;;  %s613_s22 = int_to_ptr.vmem [resolvable:$false] %s612_s22 }
  0x20   : > { %s614_s26 = scalar_lea.vmem %s613_s22, 256  ;;  %p615_p11 = scmp.lt.s32.totalorder %s800_s5, %s613_s22 }
  0x21   : > { %p610_p0 = pnand %p608_p12, %p594_p13  ;;  %p616_p2 = scmp.lt.s32.totalorder %s614_s26, %s607_s20 }
  0x23   : > { %p611_p10 = pneg %p610_p0  ;;  %p617_p3 = por %p616_p2, %p615_p11 }
  0x25   : > { %p618_p4 = pnand %p617_p3, %p611_p10 }
  0x27   : > { %621 = shalt.err (!%p618_p4)
}
  0x28   : > { %535 = dma.hbm_to_vmem [thread:$0]  (!%p796_p9), %s792_s30, 128, %s800_s5, %s159_s7  }
  0x29   : > { %p943_p1 = scmp.lt.s32.totalorder %s706_s17, 3  ;;  %p944_p5 = scmp.ge.s32.totalorder %s706_s17, 1 }
  0x2a   : > { %s512_s28 = sshll.u32 %s785_s25, 1  ;;  %s527_s29 = sshll.u32 %s702_s16, 5 }
  0x2b   : > { %p834_p6 = pnand %p944_p5, %p943_p1  ;;  %s843_s9 = scalar_lea.hbm %s936_s1, %s527_s29 }
  0x2c   : > { %s183_s10 = scalar_lea.vmem [#allocation4], %s512_s28  ;;  %s180_s30 = scalar_lea.sflag [#allocation5], %s785_s25 }
  0x2d   : > { %s945_s27 = scalar_select %p834_p6, 1, 0 }
  0x2e   : > { %s193_s11 = sshll.u32 %s183_s10, 4  ;;  %s622_s5 = scalar_lea.hbm %s843_s9, 32  ;;  %s194_s11 = int_to_ptr.vmem [resolvable:$true] %s193_s11 }
  0x2f   : > { %p623_p10 = scmp.ne.s32.totalorder %s843_s9, %s622_s5  ;;  %s627_s18 = scalar_lea.hbm %s936_s1, 64 }
  0x30   : > { %p628_p12 = scmp.lt.u32.totalorder %s843_s9, %s936_s1  ;;  %p629_p0 = scmp.lt.u32.totalorder %s627_s18, %s622_s5 }
  0x31   : > { %p625_p11 = pnand %p623_p10, %p594_p13  ;;  %p631_p3 = scmp.lt.u32.totalorder %s622_s5, %s843_s9 }
  0x32   : > { %p630_p2 = por %p629_p0, %p628_p12 }
  0x33   : > { %p626_p8 = pneg %p625_p11 }
  0x34   : > { %p632_p4 = por %p631_p3, %p630_p2 }
  0x36   : > { %p633_p1 = pnand %p632_p4, %p626_p8 }
  0x38   : > { %636 = shalt.err (!%p633_p1)
}
  0x39   : > { %s637_s25 = scalar_lea.vmem %s194_s11, 32  ;;  %s709_s22 = smov [#allocation4]  }
  0x3a   : > { %p638_p5 = scmp.ne.s32.totalorder %s194_s11, %s637_s25  ;;  %s642_s26 = sshll.u32 %s709_s22, 4  ;;  %s643_s26 = int_to_ptr.vmem [resolvable:$false] %s642_s26 }
  0x3b   : > { %s644_s28 = scalar_lea.vmem %s643_s26, 64  ;;  %p645_p7 = scmp.lt.s32.totalorder %s194_s11, %s643_s26 }
  0x3c   : > { %p640_p10 = pnand %p638_p5, %p594_p13  ;;  %p646_p6 = scmp.lt.s32.totalorder %s644_s28, %s637_s25 }
  0x3e   : > { %p641_p11 = pneg %p640_p10  ;;  %p647_p0 = por %p646_p6, %p645_p7 }
  0x40   : > { %p648_p12 = pnand %p647_p0, %p641_p11 }
  0x42   : > { %651 = shalt.err (!%p648_p12)
}
  0x43   : > { %538 = dma.hbm_to_vmem [thread:$0]  (!%p796_p9), %s843_s9, 32, %s194_s11, %s180_s30  }
  0x44   : > { %p946_p8 = scmp.ne.s32.totalorder %s945_s27, 0 }
  0x45   : > { %s204_s29 = sand.u32 (!%p946_p8), 1, %s690_s13   ;;  %p947_p13 = scmp.ne.s32.totalorder (!%p946_p8), %s941_s23, 0 }
  0x46   : > { %202 = sbr.rel (%p946_p8) target bundleno = 275 (0x113), region = 28  ;;  %s516_s4 = sshll.u32 (!%p946_p8), %s204_s29, 3 }
  0x47   : > { %s205_s8 = scalar_lea.sflag (!%p946_p8), [#allocation3], %s204_s29  ;;  %s208_s10 = scalar_lea.vmem (!%p946_p8), [#allocation2], %s516_s4 }
  0x4d   : > { %677 = dma.done.wait (%p947_p13), %s205_s8, 128  }
  0x4e   : > { %679 = vsyncadd (%p947_p13), %s205_s8, 4294967168  ;;  %s517_s5 = sshll.u32 %s204_s29, 1  ;;  %s214_s7 = scalar_lea.sflag [#allocation5], %s204_s29 }
  0x4f   : > { %s872_s6 = scalar_lea.vmem [#allocation4], %s517_s5 }
  0x50   : > { %681 = dma.done.wait (%p947_p13), %s214_s7, 32  }
  0x51   : > { %683 = vsyncadd (%p947_p13), %s214_s7, 4294967264  ;;  %p250_p7 = scmp.lt.s32.totalorder %s698_s15, 1  ;;  %vm362_vm0 = vcmask 3072   ;;  %vm265_vm1 = vcmask 1043456   ;;  %v710_v0 = vmov 0.0   ;;  %v258_v1 = vld [vmem:[%s208_s10] sm:$0xff]  ;;  %v260_v5 = vlaneseq }
  0x52   : > { %v263_v2 = vcombine.high %v258_v1, %v258_v1  ;;  %v266_v3 = vsel %vm265_vm1, %v258_v1, -inf  ;;  %v711_v7 = vmov 839922192   ;;  %v259_v34 = vld [vmem:[%s872_s6] sm:$0x3]  ;;  %v712_v46 = vmov 0  }
  0x53   : > { %s956_s15 = smov (!%p250_p7, %s698_s15), 1  ;;  %v267_v4 = vrot.slane %v266_v3, 4  ;;  %v286_v8 = vunpack.c.l.s4 %v711_v7  ;;  %v261_v13 = vshrl.u32 %v260_v5, 7 }
  0x54   : > { %s518_s27 = sshll.u32 %s956_s15, 2  ;;  %v273_v6 = vsel %vm265_vm1, %v263_v2, -inf }
  0x55   : > { %s888_s30 = scalar_lea.vmem %s937_s2, %s518_s27  ;;  %v268_v9 = vmax.f32 %v266_v3, %v267_v4  ;;  %v274_v10 = vrot.slane %v273_v6, 4  ;;  %v287_v14 = vunpack.c.0.s8 %v286_v8  ;;  %v316_v33 = vsub.s32 0, %v261_v13  ;;  %s257_s18 = scalar_lea.vmem %s938_s3, %s518_s27 }
  0x56   : > { %363 = vst.msk [vmem:[%s888_s30] sm:$0xf] %vm362_vm0, %v710_v0  ;;  %v320_v37 = vsub.s32 1, %v261_v13  ;;  %364 = vst.msk [vmem:[%s257_s18] sm:$0xf] %vm362_vm0, %v710_v0 }
  0x57   : > { %v269_v11 = vrot.slane %v268_v9, 2  ;;  %v275_v12 = vmax.f32 %v273_v6, %v274_v10  ;;  %v290_v19 = vsub.s32 %v287_v14, %v261_v13  ;;  %v317_v40 = vrot.slane %v259_v34, %v316_v33 }
  0x58   : > { %v321_v43 = vrot.slane %v259_v34, %v320_v37 }
  0x59   : > { %v270_v15 = vmax.f32 %v268_v9, %v269_v11  ;;  %v276_v16 = vrot.slane %v275_v12, 2  ;;  %v291_v23 = vrot.slane %v261_v13, %v290_v19  ;;  %vm322_vm10 = vcmp.eq.s32.totalorder %v261_v13, %v317_v40 }
  0x5a   : > { %vm323_vm12 = vcmp.eq.s32.totalorder %v261_v13, %v321_v43  ;;  %v522_v52 = vsel %vm322_vm10, 1.0, %v710_v0 }
  0x5b   : > { %v271_v17 = vrot.slane %v270_v15, 1  ;;  %v277_v18 = vmax.f32 %v275_v12, %v276_v16  ;;  %v523_v53 = vsel %vm323_vm12, 1.0, %v710_v0  ;;  %v353_v57 = vsel %vm265_vm1, %v522_v52, 0.0 }
  0x5c   : > { %v354_v58 = vsel %vm265_vm1, %v523_v53, 0.0 }
  0x5d   : > { %v272_v20 = vmax.f32 %v270_v15, %v271_v17  ;;  %v278_v21 = vrot.slane %v277_v18, 1  ;;  %v355_v60 = vadd.f32 %v354_v58, %v353_v57  ;;  %v365_v61 = vld [vmem:[%s888_s30] sm:$0xf] }
  0x5f   : > { %v279_v22 = vmax.f32 %v277_v18, %v278_v21 }
  0x61   : > { %v282_v24 = vcombine.low %v272_v20, %v279_v22 }
  0x63   : > { %vm284_vm2 = vcmp.ge.f32.partialorder %v258_v1, %v282_v24  ;;  %v369_v1 = vld [vmem:[%s257_s18] sm:$0xf] }
  0x64   : > { %v292_v25 = vsel %vm284_vm2, %v291_v23, 4 }
  0x65   : > { %v293_v26 = vcombine.high %v292_v25, %v292_v25  ;;  %v294_v27 = vsel %vm265_vm1, %v292_v25, 2147483647 }
  0x66   : > { %v295_v28 = vrot.slane %v294_v27, 4 }
  0x67   : > { %v304_v29 = vsel %vm265_vm1, %v293_v26, 2147483647 }
  0x68   : > { %vm296_vm3 = vcmp.lt.s32.totalorder %v294_v27, %v295_v28  ;;  %v305_v30 = vrot.slane %v304_v29, 4 }
  0x69   : > { %v297_v31 = vsel %vm296_vm3, %v294_v27, %v295_v28 }
  0x6a   : > { %v298_v32 = vrot.slane %v297_v31, 2  ;;  %vm306_vm4 = vcmp.lt.s32.totalorder %v304_v29, %v305_v30 }
  0x6b   : > { %v307_v35 = vsel %vm306_vm4, %v304_v29, %v305_v30 }
  0x6c   : > { %vm299_vm5 = vcmp.lt.s32.totalorder %v297_v31, %v298_v32  ;;  %v308_v36 = vrot.slane %v307_v35, 2 }
  0x6d   : > { %v300_v38 = vsel %vm299_vm5, %v297_v31, %v298_v32 }
  0x6e   : > { %v301_v39 = vrot.slane %v300_v38, 1  ;;  %vm309_vm6 = vcmp.lt.s32.totalorder %v307_v35, %v308_v36 }
  0x6f   : > { %v310_v41 = vsel %vm309_vm6, %v307_v35, %v308_v36 }
  0x70   : > { %vm302_vm7 = vcmp.lt.s32.totalorder %v300_v38, %v301_v39  ;;  %v311_v42 = vrot.slane %v310_v41, 1 }
  0x71   : > { %v303_v44 = vsel %vm302_vm7, %v300_v38, %v301_v39 }
  0x72   : > { %vm312_vm8 = vcmp.lt.s32.totalorder %v310_v41, %v311_v42  ;;  %vm324_vm9 = vcmp.eq.s32.totalorder %v303_v44, %v317_v40 }
  0x73   : > { %v313_v45 = vsel %vm312_vm8, %v310_v41, %v311_v42  ;;  %v326_v47 = vsel %vm324_vm9, 1, %v712_v46 }
  0x74   : > { %vm325_vm11 = vcmp.eq.s32.totalorder %v313_v45, %v321_v43  ;;  %v331_v48 = vrot.slane %v326_v47, %v316_v33 }
  0x75   : > { %v327_v49 = vsel %vm325_vm11, 1, %v712_v46 }
  0x76   : > { %v335_v50 = vrot.slane %v327_v49, %v316_v33  ;;  %vm336_vm13 = vcmp.eq.s32.totalorder %v331_v48, 1 }
  0x77   : > { %vm338_vm14 = vmand %vm322_vm10, %vm336_vm13 }
  0x78   : > { %vm337_vm15 = vcmp.eq.s32.totalorder %v335_v50, 1  ;;  %v520_v51 = vsel %vm338_vm14, 1.0, %v710_v0 }
  0x79   : > { %vm339_vm2 = vmand %vm323_vm12, %vm337_vm15  ;;  %v344_v54 = vsel %vm265_vm1, %v520_v51, 0.0 }
  0x7a   : > { %v521_v55 = vsel %vm339_vm2, 1.0, %v710_v0 }
  0x7b   : > { %v345_v56 = vsel %vm265_vm1, %v521_v55, 0.0 }
  0x7c   : > { %v346_v59 = vadd.f32 %v345_v56, %v344_v54 }
  0x7e   : > { %347 = vadd.xlane.f32.xlu0 %v346_v59 }
  0x82   : > { %356 = vadd.xlane.f32.xlu0 %v355_v60 }
 0x10b   : > { %v348_v62 = vpop.xlane.xlu0 %347 }
 0x10c   : > { %v366_v63 = vadd.f32 %v365_v61, %v348_v62 }
 0x10e   : > { %368 = vst.msk [vmem:[%s888_s30] sm:$0xf] %vm362_vm0, %v366_v63 }
 0x10f   : > { %v357_v2 = vpop.xlane.xlu0 %356 }
 0x110   : > { %v370_v3 = vadd.f32 %v369_v1, %v357_v2 }
 0x112   : > { %371 = vst.msk [vmem:[%s257_s18] sm:$0xf] %vm362_vm0, %v370_v3 }
 0x113 PF: > { %s20_s17 = sadd.s32 1, %s706_s17   ;;  %s948_s12 = smov %s690_s13 }
 0x114   : > { %p17_p9 = scmp.ge.s32.totalorder %s20_s17, 4   ;;  %s949_s13 = smov %s694_s14 }
 0x115   : > { %s950_s14 = smov %s782_s24  ;;  %s951_s15 = smov %s702_s16 }
 0x116   : > { %s952_s16 = smov %s954_s19  ;;  %19 = sbr.rel (!%p17_p9) target bundleno = 6 (0x6), region = 97 }
 0x11d   :  { %405 = vsyncpa [#allocation3], 1 }
 0x11e   :  { %407 = vsyncpa [#allocation3 + $0x1], 1 }
 0x11f   :  { %408 = vsyncpa [#allocation5], 1 }
 0x120   :  { %410 = vsyncpa [#allocation5 + $0x1], 1 }

</bundles_post_ra>
